<compile_context>
chip_gen: v5e
topology: v5e:2x2
jax: 0.10.0
libtpu: 0.0.40
codegen_flags: <defaults>
</compile_context>

<pallas_src>
import jax
import jax.numpy as jnp
from jax import lax
from jax.experimental import pallas as pl
from jax.experimental.pallas import tpu as pltpu


def _round_up(x: int, k: int) -> int:
    return (x + k - 1) // k * k


def _cdiv(a: int, b: int) -> int:
    return -(-a // b)


def _linear_upsample_weights(l_in: int, l_out: int, dtype=jnp.float32):
    """Interpolation matrix W (L_out, L_in) matching
    torch.nn.Upsample(mode='linear', align_corners=False):
        out[j] = sum_i W[j, i] * x[i]."""
    scale = l_in / l_out
    j = jnp.arange(l_out, dtype=jnp.float32)
    # PyTorch area_pixel_compute_source_index (align_corners=False):
    src = jnp.maximum((j + 0.5) * scale - 0.5, 0.0)
    i0 = jnp.minimum(jnp.floor(src).astype(jnp.int32), l_in - 1)
    i1 = jnp.minimum(i0 + 1, l_in - 1)
    lam = src - i0.astype(jnp.float32)
    rows = jnp.arange(l_out)
    w = jnp.zeros((l_out, l_in), dtype)
    w = w.at[rows, i0].add((1.0 - lam).astype(dtype))
    w = w.at[rows, i1].add(lam.astype(dtype))
    return w


def _interleaved_weights(l_in: int, l_out: int, n_out_padded: int):
    """W2t = kron(W.T, I2): (2*L_in, 2*L_out), zero-padded on columns to a
    lane-dense width n_out_padded (multiple of 128)."""
    w = _linear_upsample_weights(l_in, l_out)              # (L_out, L_in)
    w2t = jnp.kron(w.T, jnp.eye(2, dtype=w.dtype))         # (2*L_in, 2*L_out)
    pad = n_out_padded - 2 * l_out
    if pad > 0:
        w2t = jnp.pad(w2t, ((0, 0), (0, pad)))
    return w2t


def _upsample_matmul_kernel(x_ref, w_ref, o_ref):
    # One MXU matmul per (row-tile) grid step; W is VMEM-resident.
    o_ref[...] = jnp.dot(
        x_ref[...], w_ref[...], preferred_element_type=jnp.float32
    ).astype(o_ref.dtype)


def complex_upsample1d(x_complex, size: int):
    """x_complex: complex64 (N, C, L_in) -> complex64 (N, C, size)."""
    n, c, l_in = x_complex.shape
    l_out = int(size)

    m = n * c
    k = 2 * l_in                      # interleaved contraction dim
    n_out = 2 * l_out                 # interleaved output dim
    n_out_p = _round_up(n_out, 128)   # lane-dense output columns

    # Interleaved float32 view of the complex input: (M, 2*L_in).
    xf = jnp.stack(
        [jnp.real(x_complex).astype(jnp.float32),
         jnp.imag(x_complex).astype(jnp.float32)],
        axis=-1,
    )
    x2 = xf.reshape(m, k)

    w2t = _interleaved_weights(l_in, l_out, n_out_p)       # (k, n_out_p)

    # ---- Row-tile selection: fit double-buffered X/O tiles + resident W in a
    # VMEM budget that works on every generation (v7x: 64 MiB physical).
    w_bytes = 4 * k * n_out_p
    budget = (24 << 20) - w_bytes
    per_row = 2 * 4 * (k + n_out_p)                        # 2 buffers * f32 * (X + O)
    tm_cap = max(8, min(512, budget // max(per_row, 1)))
    tm_cap = max(8, (tm_cap // 8) * 8)

    m8 = _round_up(m, 8)
    num_tiles = max(1, _cdiv(m8, tm_cap))
    tm = _round_up(_cdiv(m8, num_tiles), 8)
    m_p = tm * num_tiles
    if m_p != m:
        x2 = jnp.pad(x2, ((0, m_p - m), (0, 0)))

    vmem_needed = 2 * 4 * tm * (k + n_out_p) + w_bytes + (1 << 20)
    vmem_limit = None
    if vmem_needed > (32 << 20):
        vmem_limit = min(vmem_needed, 48 << 20)

    cost = pl.CostEstimate(
        flops=2 * m_p * k * n_out_p,
        transcendentals=0,
        bytes_accessed=4 * (m_p * k + k * n_out_p + m_p * n_out_p),
    )

    out2 = pl.pallas_call(
        _upsample_matmul_kernel,
        out_shape=jax.ShapeDtypeStruct((m_p, n_out_p), jnp.float32),
        grid=(num_tiles,),
        in_specs=[
            pl.BlockSpec((tm, k), lambda i: (i, 0)),        # row tile of X
            pl.BlockSpec((k, n_out_p), lambda i: (0, 0)),   # resident weights
        ],
        out_specs=pl.BlockSpec((tm, n_out_p), lambda i: (i, 0)),
        compiler_params=pltpu.CompilerParams(
            dimension_semantics=("parallel",),
            vmem_limit_bytes=vmem_limit,
        ),
        cost_estimate=cost,
    )(x2, w2t)

    # Strip row/column padding and reassemble complex output (still interleaved
    # [re, im] along the trailing axis).
    o = out2[:m, :n_out].reshape(n, c, l_out, 2)
    return lax.complex(o[..., 0], o[..., 1])


def _reference_complex_upsample1d(x_complex, size: int):
    """Pure-JAX reference (align_corners=False) for validation."""
    n, c, l_in = x_complex.shape
    w = _linear_upsample_weights(l_in, size)               # (L_out, L_in)
    xr = jnp.real(x_complex).astype(jnp.float32)
    xi = jnp.imag(x_complex).astype(jnp.float32)
    orr = jnp.einsum("oc,nkc->nko", w, xr)
    oii = jnp.einsum("oc,nkc->nko", w, xi)
    return orr + 1j * oii


if __name__ == "__main__":
    # Small shapes consistent with the module: complex input (N, C, L_in).
    N, C, L_IN, SIZE = 2, 4, 16, 32

    key = jax.random.PRNGKey(0)
    kr, ki = jax.random.split(key)
    x_real = jax.random.normal(kr, (N, C, L_IN), dtype=jnp.float32)
    x_imag = jax.random.normal(ki, (N, C, L_IN), dtype=jnp.float32)
    x = (x_real + 1j * x_imag).astype(jnp.complex64)

    out = complex_upsample1d(x, SIZE)
    out = jax.block_until_ready(out)

    ref = _reference_complex_upsample1d(x, SIZE)
    assert out.shape == (N, C, SIZE), out.shape
    assert out.dtype == jnp.complex64, out.dtype
    assert jnp.allclose(out, ref, atol=1e-5, rtol=1e-5)

    print("KERNEL_OK")
</pallas_src>

<mosaic_0001>
module attributes {stable_mosaic.version = 11 : i64} {
  func.func @_upsample_matmul_kernel(%arg0: i32, %arg1: memref<8x32xf32, #tpu.memory_space<vmem>>, %arg2: memref<32x128xf32, #tpu.memory_space<vmem>>, %arg3: memref<8x128xf32, #tpu.memory_space<vmem>>) attributes {dimension_semantics = [#tpu.dimension_semantics<parallel>], iteration_bounds = array<i64: 1>, scalar_prefetch = 0 : i64, scratch_operands = 0 : i64, tpu.core_type = #tpu.core_type<tc>, window_params = [{transform_indices = @transform_0, window_bounds = array<i64: 8, 32>}, {pipeline_mode = #tpu.pipeline_mode<synchronous>, transform_indices = @transform_1, window_bounds = array<i64: 32, 128>}, {transform_indices = @transform_2, window_bounds = array<i64: 8, 128>}]} {
    %c0 = arith.constant 0 : index
    %c0_0 = arith.constant 0 : index
    %0 = vector.load %arg1[%c0, %c0_0] : memref<8x32xf32, #tpu.memory_space<vmem>>, vector<8x32xf32>
    %c0_1 = arith.constant 0 : index
    %c0_2 = arith.constant 0 : index
    %1 = vector.load %arg2[%c0_1, %c0_2] : memref<32x128xf32, #tpu.memory_space<vmem>>, vector<32x128xf32>
    %cst = arith.constant dense<0.000000e+00> : vector<8x128xf32>
    %2 = tpu.matmul %0, %1, %cst {dimension_numbers = #tpu.dot_dimension_numbers<[1], [0], [0], [1], [0, 0, 1, 1], [], []>} : vector<8x32xf32>, vector<32x128xf32>, vector<8x128xf32> -> vector<8x128xf32>
    %c0_3 = arith.constant 0 : index
    %c0_4 = arith.constant 0 : index
    %3 = vector.load %arg3[%c0_3, %c0_4] : memref<8x128xf32, #tpu.memory_space<vmem>>, vector<8x128xf32>
    tpu.vector_store %arg3[%c0_3, %c0_4], %2 {strides = array<i32>} : memref<8x128xf32, #tpu.memory_space<vmem>>, vector<8x128xf32>,
    return
  }
  func.func @transform_0(%arg0: i32) -> (i32, i32) {
    %c0_i32 = arith.constant 0 : i32
    %c0_i32_0 = arith.constant 0 : i32
    return %arg0, %c0_i32 : i32, i32
  }
  func.func @transform_1(%arg0: i32) -> (i32, i32) {
    %c0_i32 = arith.constant 0 : i32
    %c0_i32_0 = arith.constant 0 : i32
    %c0_i32_1 = arith.constant 0 : i32
    return %c0_i32, %c0_i32_0 : i32, i32
  }
  func.func @transform_2(%arg0: i32) -> (i32, i32) {
    %c0_i32 = arith.constant 0 : i32
    %c0_i32_0 = arith.constant 0 : i32
    return %arg0, %c0_i32 : i32, i32
  }
}

</mosaic_0001>

<bundles_post_ra>
// kernel: tpu_custom_call.1
= control target key start
LH: loop header
LB: loop body
LE: loop exit
PB: predicated region body
PF: predicated region fallthrough
CT: control target
= control target key end

     0   :  { %7 = vsyncpa [#allocation3], 0  ;;  %s203_s0 = inlined_call_operand.hbm [shape: f32[8,32], index: 0, kind: input, shape index: {}]   ;;  %s204_s1 = inlined_call_operand.hbm [shape: f32[32,128], index: 1, kind: input, shape index: {}]   ;;  %s205_s2 = inlined_call_operand.hbm [shape: f32[8,128], index: 2, kind: output, shape index: {}]  }
   0x1   :  { %8 = vsyncpa [#allocation6], 0 }
   0x2   :  { %9 = vsyncpa [#allocation4], 0  ;;  %s15_s11 = sshll.u32 %s203_s0, 4  ;;  %s174_s12 = smov [#allocation2]   ;;  %s16_s11 = int_to_ptr.hbm [resolvable:$true] %s15_s11 }
   0x3   :  { %s17_s13 = sshll.u32 %s174_s12, 4  ;;  %s25_s16 = sshll.u32 %s204_s1, 4  ;;  %s18_s13 = int_to_ptr.vmem [resolvable:$true] %s17_s13  ;;  %s26_s16 = int_to_ptr.hbm [resolvable:$true] %s25_s16 }
   0x4   :  { %20 = dma.hbm_to_vmem [thread:$0]  %s16_s11, 128, %s18_s13, [#allocation3]  }
   0x5   :  { %s175_s17 = smov [#allocation5]   ;;  %s176_s19 = smov 128  }
   0x6   :  { %s27_s18 = sshll.u32 %s175_s17, 4  ;;  %s177_s20 = smov 8   ;;  %s28_s18 = int_to_ptr.vmem [resolvable:$true] %s27_s18 }
   0x7   :  { %33 = dma.hbm_to_vmem [thread:$0]  %s26_s16, 512, %s28_s18, [#allocation6], %s176_s19, %s176_s19, %s177_s20  }
   0x8   :  { %168 = dma.done.wait [#allocation3], 128  }
   0x9   :  { %169 = vsyncadd [#allocation3], 4294967168 }
   0xa   :  { %170 = dma.done.wait [#allocation6], 512  }
   0xb   :  { %171 = vsyncadd [#allocation6], 4294966784  ;;  %v46_v0 = vld [vmem:[#allocation5 + $0x18] sm:$0xff]  ;;  %v45_v1 = vld [vmem:[#allocation5 + $0x10] sm:$0xff]  ;;  %vm47_vm0 = vcmask 261120   ;;  %s178_s0 = smov [#allocation7]  }
   0xc   :  { %63 = vmatpush.msra.mxu0 %v46_v0  ;;  %v44_v2 = vld [vmem:[#allocation5 + $0x8] sm:$0xff]  ;;  %v43_v3 = vld [vmem:[#allocation5] sm:$0xff]  ;;  %v42_v4 = vld [vmem:[#allocation2] sm:$0xff]  ;;  %s77_s1 = sshll.u32 %s178_s0, 4  ;;  %s79_s23 = sshll.u32 %s205_s2, 4  ;;  %s78_s1 = int_to_ptr.vmem [resolvable:$true] %s77_s1  ;;  %s80_s23 = int_to_ptr.hbm [resolvable:$true] %s79_s23 }
   0xe   :  { %64 = vmatpush.msra.mxu0 %v45_v1 }
  0x10   :  { %65 = vmatpush.msra.mxu0 %v44_v2 }
  0x12   :  { %66 = vmatpush.msra.mxu0 %v43_v3 }
  0x13   :  { %90 = vmatmul.msk.f32.vlgmr.msra.gmra.mxu0 %vm47_vm0, %v42_v4 }
  0x90   :  { %v68_v5 = vpop.f32.mrf.mxu0 }
  0x91   :  { %71 = vst [vmem:[#allocation7] sm:$0xff] %v68_v5 }
  0x92   :  { %82 = dma.vmem_to_hbm [thread:$0]  %s78_s1, 128, %s80_s23, [#allocation4]  }
  0x93   :  { %172 = dma.done.wait [#allocation4], 128  }
  0x94   :  { %173 = vsyncadd [#allocation4], 4294967168 }
  0x95   :  { %87 = vsyncpa [#allocation3], 1 }
  0x96   :  { %88 = vsyncpa [#allocation6], 1 }
  0x97   :  { %89 = vsyncpa [#allocation4], 1 }

</bundles_post_ra>
